<compile_context>
chip_gen: v6e
topology: v6e:2x2x1
jax: 0.10.0
libtpu: 0.0.40
codegen_flags: <defaults>
</compile_context>

<pallas_src>
import functools

import jax
import jax.numpy as jnp
from jax.experimental import pallas as pl
from jax.experimental.pallas import tpu as pltpu


def rgcn_kernel(flags_ref, a_ref, w_ref, x_ref, y_ref, ax_ref, *, tn, x_resident):
    # grid = (m_tiles [parallel], num_rels [arbitrary], n_tiles [arbitrary])
    i = pl.program_id(0)
    r = pl.program_id(1)
    kn = pl.program_id(2)
    num_rels = pl.num_programs(1)
    n_k = pl.num_programs(2)

    # Per-(m-tile, relation) aggregation accumulator: reset at the first n tile.
    @pl.when(kn == 0)
    def _():
        ax_ref[...] = jnp.zeros_like(ax_ref)

    # Block-level sparsity: skip the aggregation matmul for structurally-empty blocks.
    nz = flags_ref[(i * num_rels + r) * n_k + kn]

    @pl.when(nz > 0)
    def _():
        if x_resident:
            start = pl.multiple_of(kn * tn, tn)
            x_blk = x_ref[pl.ds(start, tn), :]
        else:
            x_blk = x_ref[...]
        # int8 {0,1} mask -> f32 -> bf16 (exact values; two-step cast keeps the
        # lowering on well-supported convert paths); bf16 x bf16 -> f32 MXU accum.
        a_blk = a_ref[...].astype(jnp.float32).astype(jnp.bfloat16)
        ax_ref[...] += jnp.dot(a_blk, x_blk, preferred_element_type=jnp.float32)

    # Transform once per (m-tile, relation): (A @ X) @ W[r]^T, reduced over relations
    # directly into the resident output block (assign at r==0: no separate zero pass).
    @pl.when(kn == n_k - 1)
    def _():
        contrib = jnp.dot(ax_ref[...], w_ref[r], preferred_element_type=jnp.float32)

        @pl.when(r == 0)
        def _():
            y_ref[...] = contrib

        @pl.when(r > 0)
        def _():
            y_ref[...] += contrib


def _round_up(x, mult):
    return ((x + mult - 1) // mult) * mult


def rgcn_forward(A, W, X, *, tm=512, tn=2048, block_flags=None, x_resident=None):
    """A: (R, m, n) {0,1} mask, W: (R, out_feat, in_feat), X: (n, in_feat) -> (m, out_feat) f32.

    block_flags: optional precomputed (m_tiles, num_rels, n_tiles) nonzero-block flags
    (e.g. derived from hetero-graph node-type ranges); scanned from A if None.
    x_resident: force/disable the VMEM-resident X path (None = auto by VMEM budget).
    """
    num_rels, m, n = A.shape
    _, out_feat, in_feat = W.shape
    assert X.shape == (n, in_feat)

    # Feature dims padded lane-dense (128): MXU-time neutral (N < 128 still costs a
    # full MXU pass), keeps stores unmasked; with resident X it is only a small VMEM
    # footprint cost.
    in_pad = _round_up(in_feat, 128)
    out_pad = _round_up(out_feat, 128)

    # int8 A tiles need (32, 128)-aligned blocks; clamp to the problem size and aim
    # for >=2 m-tiles so the "parallel" axis can shard across v7x's 2 TensorCores.
    tm = min(_round_up(max(tm, 32), 32), _round_up(m, 32))
    tn = min(_round_up(max(tn, 128), 128), _round_up(n, 128))
    if m > 64:
        tm = min(tm, _round_up((m + 1) // 2, 32))

    # Per-generation VMEM budget (128 MiB on v5e/v6e, 64 MiB per TensorCore on v7x).
    try:
        vmem_cap = int(pltpu.get_tpu_info().vmem_capacity_bytes)
    except Exception:
        vmem_cap = 64 * 1024 * 1024  # conservative fallback (v7x per-TC)
    budget = int(0.70 * vmem_cap)

    def vmem_need(tm_, tn_, x_res):
        n_pad_ = _round_up(n, tn_)
        return (2 * tm_ * tn_                                   # A int8, double-buffered
                + (2 * n_pad_ * in_pad * 2 if x_res             # X resident (bf16)
                   else 2 * tn_ * in_pad * 2)                   # X streamed n-tile
                + 2 * num_rels * in_pad * out_pad * 4           # W^T resident (f32)
                + 2 * tm_ * out_pad * 4                         # Y block (f32)
                + tm_ * in_pad * 4)                             # ax scratch (f32)

    if x_resident is None:
        x_resident = vmem_need(tm, tn, True) <= budget
    while vmem_need(tm, tn, x_resident) > budget and tn > 512:
        tn = max(512, tn // 2)
    while vmem_need(tm, tn, x_resident) > budget and tm > 64:
        tm = max(64, tm // 2)

    m_pad = _round_up(m, tm)
    n_pad = _round_up(n, tn)
    mt, nt = m_pad // tm, n_pad // tn

    # Host-side prep: pad only when needed.  Production callers should hand in A
    # already as a (pre-padded) int8 mask so the dominant operand is never re-copied.
    A_i8 = A if A.dtype == jnp.int8 else (A != 0).astype(jnp.int8)
    if (m_pad, n_pad) != (m, n):
        A_i8 = jnp.pad(A_i8, ((0, 0), (0, m_pad - m), (0, n_pad - n)))
    X_bf = X.astype(jnp.bfloat16)
    if (n_pad, in_pad) != (n, in_feat):
        X_bf = jnp.pad(X_bf, ((0, n_pad - n), (0, in_pad - in_feat)))
    # W pre-transposed to (R, in_pad, out_pad) so the epilogue is a plain jnp.dot.
    W_t = jnp.transpose(W.astype(jnp.float32), (0, 2, 1))
    if (in_pad, out_pad) != (in_feat, out_feat):
        W_t = jnp.pad(W_t, ((0, 0), (0, in_pad - in_feat), (0, out_pad - out_feat)))

    if block_flags is None:
        # TODO(synk): on real hetero graphs derive these from per-relation node-type
        # ranges instead of scanning A.
        blk = A_i8.reshape(num_rels, mt, tm, nt, tn)
        flags = jnp.any(blk != 0, axis=(2, 4))            # (R, mt, nt)
        flags = jnp.transpose(flags, (1, 0, 2))           # (mt, R, nt)
    else:
        flags = block_flags
    flags = flags.reshape(-1).astype(jnp.int32)

    grid = (mt, num_rels, nt)

    if x_resident:
        x_spec = pl.BlockSpec((n_pad, in_pad), lambda i, r, k, f: (0, 0))
    else:
        x_spec = pl.BlockSpec((tn, in_pad), lambda i, r, k, f: (k, 0))

    in_specs = [
        # A[r] tile (int8), relation dim squeezed out of the kernel ref.
        pl.BlockSpec((pl.Squeezed(), tm, tn), lambda i, r, k, f: (r, i, k)),
        # W^T fully resident, indexed by relation inside the kernel.
        pl.BlockSpec((num_rels, in_pad, out_pad), lambda i, r, k, f: (0, 0, 0)),
        x_spec,
    ]
    out_spec = pl.BlockSpec((tm, out_pad), lambda i, r, k, f: (i, 0))

    # Advisory cost estimate for XLA scheduling around the kernel.
    flops = (2 * num_rels * m_pad * n_pad * in_pad
             + 2 * num_rels * m_pad * in_pad * out_pad)
    bytes_accessed = (num_rels * m_pad * n_pad                               # A int8
                      + n_pad * in_pad * 2 * (1 if x_resident else mt * num_rels)
                      + num_rels * in_pad * out_pad * 4                      # W
                      + m_pad * out_pad * 4)                                 # Y
    cost = pl.CostEstimate(flops=int(flops), transcendentals=0,
                           bytes_accessed=int(bytes_accessed))

    need = vmem_need(tm, tn, x_resident)
    vmem_limit = int(min(int(0.85 * vmem_cap), max(need + (4 << 20), 32 << 20)))

    kernel = functools.partial(rgcn_kernel, tn=tn, x_resident=x_resident)
    y_pad = pl.pallas_call(
        kernel,
        out_shape=jax.ShapeDtypeStruct((m_pad, out_pad), jnp.float32),
        grid_spec=pltpu.PrefetchScalarGridSpec(
            num_scalar_prefetch=1,
            grid=grid,
            in_specs=in_specs,
            out_specs=out_spec,
            scratch_shapes=[pltpu.VMEM((tm, in_pad), jnp.float32)],
        ),
        compiler_params=pltpu.CompilerParams(
            dimension_semantics=("parallel", "arbitrary", "arbitrary"),
            vmem_limit_bytes=vmem_limit,
        ),
        cost_estimate=cost,
    )(flags, A_i8, W_t, X_bf)

    return y_pad[:m, :out_feat]


def reference_forward(A, W, X):
    # Y[i, fo] = sum_r sum_j A[r,i,j] * sum_fi W[r,fo,fi] * X[j,fi]
    # (computed on the same bf16-quantized X the kernel consumes; A is exact {0,1})
    X_q = X.astype(jnp.bfloat16).astype(jnp.float32)
    return jnp.einsum("rij,rof,jf->io", A.astype(jnp.float32), W, X_q)


def _run_case(key, num_rels, m, n, in_feat, out_feat, *, tm=512, tn=2048,
              zero_rel=None, x_resident=None):
    k_a, k_w, k_x = jax.random.split(key, 3)
    A = jax.random.bernoulli(k_a, p=0.15, shape=(num_rels, m, n)).astype(jnp.float32)
    if zero_rel is not None:
        # Structured (hetero-graph style) sparsity: an edge-free relation exercises
        # the block-skip path and the r==0 assign epilogue.
        A = A.at[zero_rel].set(0.0)
    W = jax.random.normal(k_w, (num_rels, out_feat, in_feat), dtype=jnp.float32) * 0.1
    X = jax.random.normal(k_x, (n, in_feat), dtype=jnp.float32)

    Y = rgcn_forward(A, W, X, tm=tm, tn=tn, x_resident=x_resident)
    Y = jax.block_until_ready(Y)
    Y_ref = reference_forward(A, W, X)

    assert Y.shape == (m, out_feat)
    assert jnp.allclose(Y, Y_ref, atol=1e-4, rtol=1e-4), "mismatch vs reference"


if __name__ == "__main__":
    key = jax.random.PRNGKey(0)
    k1, k2, k3 = jax.random.split(key, 3)

    # Small case (single tile along every axis, resident X).
    _run_case(k1, num_rels=3, m=32, n=48, in_feat=16, out_feat=32)

    # Multi-tile case: m/n tiling, padding, relation + n-tile reductions, and
    # block-skipping for an edge-free relation.
    _run_case(k2, num_rels=4, m=300, n=700, in_feat=16, out_feat=32,
              tm=128, tn=256, zero_rel=1)

    # Streamed-X fallback path (forced) so both kernel variants stay compile-tested.
    _run_case(k3, num_rels=2, m=96, n=400, in_feat=16, out_feat=32,
              tm=64, tn=128, x_resident=False)

    print("KERNEL_OK")
</pallas_src>

<mosaic_0001>
module attributes {stable_mosaic.version = 11 : i64} {
  func.func @rgcn_kernel(%arg0: i32, %arg1: i32, %arg2: i32, %arg3: memref<3xi32, #tpu.memory_space<smem>>, %arg4: memref<1x32x128xi8, #tpu.memory_space<vmem>>, %arg5: memref<3x128x128xf32, #tpu.memory_space<vmem>>, %arg6: memref<128x128xbf16, #tpu.memory_space<vmem>>, %arg7: memref<32x128xf32, #tpu.memory_space<vmem>>, %arg8: memref<32x128xf32, #tpu.memory_space<vmem>>) attributes {dimension_semantics = [#tpu.dimension_semantics<parallel>, #tpu.dimension_semantics<arbitrary>, #tpu.dimension_semantics<arbitrary>], iteration_bounds = array<i64: 1, 3, 1>, scalar_prefetch = 1 : i64, scratch_operands = 1 : i64, tpu.core_type = #tpu.core_type<tc>, window_params = [{transform_indices = @transform_0, window_bounds = array<i64: 1, 32, 128>}, {pipeline_mode = #tpu.pipeline_mode<synchronous>, transform_indices = @transform_1, window_bounds = array<i64: 3, 128, 128>}, {pipeline_mode = #tpu.pipeline_mode<synchronous>, transform_indices = @transform_2, window_bounds = array<i64: 128, 128>}, {transform_indices = @transform_3, window_bounds = array<i64: 32, 128>}]} {
    %c0_i32 = arith.constant 0 : i32
    %0 = arith.cmpi eq, %arg2, %c0_i32 : i32
    %1 = arith.extui %0 : i1 to i32
    %c0_i32_0 = arith.constant 0 : i32
    %2 = arith.cmpi ne, %1, %c0_i32_0 : i32
    scf.if %2 {
      %cst = arith.constant 0.000000e+00 : f32
      %15 = vector.broadcast %cst : f32 to vector<32x128xf32>
      %c0 = arith.constant 0 : index
      %c0_5 = arith.constant 0 : index
      %16 = vector.load %arg8[%c0, %c0_5] : memref<32x128xf32, #tpu.memory_space<vmem>>, vector<32x128xf32>
      tpu.vector_store %arg8[%c0, %c0_5], %15 {strides = array<i32>} : memref<32x128xf32, #tpu.memory_space<vmem>>, vector<32x128xf32>,
    } else {
    }
    %c3_i32 = arith.constant 3 : i32
    %3 = arith.muli %arg0, %c3_i32 : i32
    %4 = arith.addi %3, %arg1 : i32
    %c1_i32 = arith.constant 1 : i32
    %5 = arith.muli %4, %c1_i32 : i32
    %6 = arith.addi %5, %arg2 : i32
    %7 = arith.index_cast %6 : i32 to index
    %8 = memref.load %arg3[%7] : memref<3xi32, #tpu.memory_space<smem>>
    %c0_i32_1 = arith.constant 0 : i32
    %9 = arith.cmpi sgt, %8, %c0_i32_1 : i32
    %10 = arith.extui %9 : i1 to i32
    %c0_i32_2 = arith.constant 0 : i32
    %11 = arith.cmpi ne, %10, %c0_i32_2 : i32
    scf.if %11 {
      %c128_i32 = arith.constant 128 : i32
      %15 = arith.muli %arg2, %c128_i32 : i32
      %16 = tpu.assume_multiple %15, 128 : i32
      %17 = arith.index_cast %16 : i32 to index
      %c0 = arith.constant 0 : index
      %18 = vector.load %arg6[%17, %c0] : memref<128x128xbf16, #tpu.memory_space<vmem>>, vector<128x128xbf16>
      %c0_5 = arith.constant 0 : index
      %c0_6 = arith.constant 0 : index
      %c0_7 = arith.constant 0 : index
      %19 = vector.load %arg4[%c0_5, %c0_6, %c0_7] : memref<1x32x128xi8, #tpu.memory_space<vmem>>, vector<1x32x128xi8>
      %20 = vector.shape_cast %19 : vector<1x32x128xi8> to vector<32x128xi8>
      %21 = arith.sitofp %20 : vector<32x128xi8> to vector<32x128xf32>
      %22 = arith.truncf %21 : vector<32x128xf32> to vector<32x128xbf16>
      %c0_8 = arith.constant 0 : index
      %c0_9 = arith.constant 0 : index
      %23 = vector.load %arg8[%c0_8, %c0_9] : memref<32x128xf32, #tpu.memory_space<vmem>>, vector<32x128xf32>
      %cst = arith.constant dense<0.000000e+00> : vector<32x128xf32>
      %24 = tpu.matmul %22, %18, %cst {dimension_numbers = #tpu.dot_dimension_numbers<[1], [0], [0], [1], [0, 0, 1, 1], [], []>} : vector<32x128xbf16>, vector<128x128xbf16>, vector<32x128xf32> -> vector<32x128xf32>
      %25 = arith.addf %23, %24 : vector<32x128xf32>
      %c0_10 = arith.constant 0 : index
      %c0_11 = arith.constant 0 : index
      %26 = vector.load %arg8[%c0_10, %c0_11] : memref<32x128xf32, #tpu.memory_space<vmem>>, vector<32x128xf32>
      tpu.vector_store %arg8[%c0_10, %c0_11], %25 {strides = array<i32>} : memref<32x128xf32, #tpu.memory_space<vmem>>, vector<32x128xf32>,
    } else {
    }
    %c0_i32_3 = arith.constant 0 : i32
    %12 = arith.cmpi eq, %arg2, %c0_i32_3 : i32
    %13 = arith.extui %12 : i1 to i32
    %c0_i32_4 = arith.constant 0 : i32
    %14 = arith.cmpi ne, %13, %c0_i32_4 : i32
    scf.if %14 {
      %c0 = arith.constant 0 : index
      %c0_5 = arith.constant 0 : index
      %15 = vector.load %arg8[%c0, %c0_5] : memref<32x128xf32, #tpu.memory_space<vmem>>, vector<32x128xf32>
      %16 = arith.index_cast %arg1 : i32 to index
      %c0_6 = arith.constant 0 : index
      %c0_7 = arith.constant 0 : index
      %17 = vector.load %arg5[%16, %c0_6, %c0_7] : memref<3x128x128xf32, #tpu.memory_space<vmem>>, vector<1x128x128xf32>
      %18 = vector.shape_cast %17 : vector<1x128x128xf32> to vector<128x128xf32>
      %cst = arith.constant dense<0.000000e+00> : vector<32x128xf32>
      %19 = tpu.matmul %15, %18, %cst {dimension_numbers = #tpu.dot_dimension_numbers<[1], [0], [0], [1], [0, 0, 1, 1], [], []>} : vector<32x128xf32>, vector<128x128xf32>, vector<32x128xf32> -> vector<32x128xf32>
      %c0_i32_8 = arith.constant 0 : i32
      %20 = arith.cmpi eq, %arg1, %c0_i32_8 : i32
      %21 = arith.extui %20 : i1 to i32
      %c0_i32_9 = arith.constant 0 : i32
      %22 = arith.cmpi ne, %21, %c0_i32_9 : i32
      scf.if %22 {
        %c0_12 = arith.constant 0 : index
        %c0_13 = arith.constant 0 : index
        %26 = vector.load %arg7[%c0_12, %c0_13] : memref<32x128xf32, #tpu.memory_space<vmem>>, vector<32x128xf32>
        tpu.vector_store %arg7[%c0_12, %c0_13], %19 {strides = array<i32>} : memref<32x128xf32, #tpu.memory_space<vmem>>, vector<32x128xf32>,
      } else {
      }
      %c0_i32_10 = arith.constant 0 : i32
      %23 = arith.cmpi sgt, %arg1, %c0_i32_10 : i32
      %24 = arith.extui %23 : i1 to i32
      %c0_i32_11 = arith.constant 0 : i32
      %25 = arith.cmpi ne, %24, %c0_i32_11 : i32
      scf.if %25 {
        %c0_12 = arith.constant 0 : index
        %c0_13 = arith.constant 0 : index
        %26 = vector.load %arg7[%c0_12, %c0_13] : memref<32x128xf32, #tpu.memory_space<vmem>>, vector<32x128xf32>
        %27 = arith.addf %26, %19 : vector<32x128xf32>
        %c0_14 = arith.constant 0 : index
        %c0_15 = arith.constant 0 : index
        %28 = vector.load %arg7[%c0_14, %c0_15] : memref<32x128xf32, #tpu.memory_space<vmem>>, vector<32x128xf32>
        tpu.vector_store %arg7[%c0_14, %c0_15], %27 {strides = array<i32>} : memref<32x128xf32, #tpu.memory_space<vmem>>, vector<32x128xf32>,
      } else {
      }
    } else {
    }
    return
  }
  func.func @transform_0(%arg0: i32, %arg1: i32, %arg2: i32, %arg3: memref<3xi32, #tpu.memory_space<smem>>) -> (i32, i32, i32) {
    %c0_i32 = arith.constant 0 : i32
    return %arg1, %arg0, %arg2 : i32, i32, i32
  }
  func.func @transform_1(%arg0: i32, %arg1: i32, %arg2: i32, %arg3: memref<3xi32, #tpu.memory_space<smem>>) -> (i32, i32, i32) {
    %c0_i32 = arith.constant 0 : i32
    %c0_i32_0 = arith.constant 0 : i32
    %c0_i32_1 = arith.constant 0 : i32
    %c0_i32_2 = arith.constant 0 : i32
    return %c0_i32, %c0_i32_0, %c0_i32_1 : i32, i32, i32
  }
  func.func @transform_2(%arg0: i32, %arg1: i32, %arg2: i32, %arg3: memref<3xi32, #tpu.memory_space<smem>>) -> (i32, i32) {
    %c0_i32 = arith.constant 0 : i32
    %c0_i32_0 = arith.constant 0 : i32
    %c0_i32_1 = arith.constant 0 : i32
    return %c0_i32, %c0_i32_0 : i32, i32
  }
  func.func @transform_3(%arg0: i32, %arg1: i32, %arg2: i32, %arg3: memref<3xi32, #tpu.memory_space<smem>>) -> (i32, i32) {
    %c0_i32 = arith.constant 0 : i32
    %c0_i32_0 = arith.constant 0 : i32
    return %arg0, %c0_i32 : i32, i32
  }
}

</mosaic_0001>

<bundles_post_ra>
// kernel: tpu_custom_call.1
= control target key start
LH: loop header
LB: loop body
LE: loop exit
PB: predicated region body
PF: predicated region fallthrough
CT: control target
= control target key end

     0   :  { %s1044_s15 = smov [#allocation4]   ;;  %s1254_s0 = inlined_call_operand.hbm [shape: s32[3], index: 0, kind: input, shape index: {}]   ;;  %s1255_s1 = inlined_call_operand.hbm [shape: s8[3,32,128], index: 1, kind: input, shape index: {}]   ;;  %s1256_s2 = inlined_call_operand.hbm [shape: f32[3,128,128], index: 2, kind: input, shape index: {}]   ;;  %s1257_s3 = inlined_call_operand.hbm [shape: bf16[128,128], index: 3, kind: input, shape index: {}]   ;;  %s1258_s4 = inlined_call_operand.hbm [shape: f32[32,128], index: 4, kind: output, shape index: {}]  }
   0x1   :  { %10 = dma.hbm_to_smem %s1254_s0, 16, %s1044_s15, [#allocation3] }
   0x2   :  { %1006 = dma.done.wait [#allocation3], 16 }
   0x3   :  { %1007 = vsyncadd [#allocation3], 4294967280 }
   0x4   :  { %12 = sfence }
   0x5   :  { %13 = vsyncpa [#allocation6], 0 }
   0x6   :  { %15 = vsyncpa [#allocation6 + $0x1], 0 }
   0x7   :  { %16 = vsyncpa [#allocation9], 0 }
   0x8   :  { %17 = vsyncpa [#allocation7], 0  ;;  %s1084_s18 = smov 0   ;;  %s1086_s19 = smov 0  }
   0x9   :  { %s1088_s20 = smov 0   ;;  %s1090_s21 = smov 0  }
   0xa   :  { %s1092_s22 = smov 0   ;;  %s1094_s23 = smov 0  }
   0xb LB: > { %s624_s0 = sadd.s32 4294967295, %s1042_s23   ;;  %p66_p0 = scmp.ne.s32.totalorder %s1026_s19, %s1022_s18  ;;  %s1042_s23 = sphi %s1094_s23, %s23_s23   ;;  %s1038_s22 = sphi %s1092_s22, %s1272_s22   ;;  %s1034_s21 = sphi %s1090_s21, %s1271_s21   ;;  %s1030_s20 = sphi %s1088_s20, %s1270_s20   ;;  %s1026_s19 = sphi %s1086_s19, %s1269_s19   ;;  %s1022_s18 = sphi %s1084_s18, %s1268_s18  }
   0xc   : > { %p1116_p1 = scmp.eq.s32.totalorder %s624_s0, 0  ;;  %p625_p2 = scmp.ge.s32.totalorder %s1042_s23, 1 }
   0xd   : > { %p145_p3 = scmp.lt.s32.totalorder %s1042_s23, 4  ;;  %s1045_s27 = smov [#allocation8]  }
   0xe   : > { %s1261_s24 = scalar_select %p1116_p1, 1, 0 }
   0xf   : > { %p1124_p4 = por %p1116_p1, %p66_p0  ;;  %p1128_p5 = pnand %p625_p2, %p145_p3 }
  0x10   : > { %s157_s28 = sshll.u32 %s1045_s27, 4  ;;  %s1046_s30 = smov [#allocation10]   ;;  %s158_s28 = int_to_ptr.vmem [resolvable:$true] %s157_s28 }
  0x11   : > { %p785_p6 = pneg %p1128_p5  ;;  %s170_s5 = sshll.u32 %s1046_s30, 4  ;;  %s171_s5 = int_to_ptr.vmem [resolvable:$true] %s170_s5 }
  0x12   : > { %s889_s6 = scalar_lea.vmem %s158_s28, 6144  ;;  %p897_p12 = scmp.lt.s32.totalorder %s158_s28, %s158_s28 }
  0x13   : > { %p1136_p7 = pnand %p785_p6, %p1116_p1  ;;  %p890_p9 = scmp.ne.s32.totalorder %s158_s28, %s889_s6 }
  0x14   : > { %p898_p13 = scmp.lt.s32.totalorder %s889_s6, %s889_s6 }
  0x15   : > { %p880_p8 = pneg %p1136_p7 }
  0x16   : > { %p899_p0 = por %p898_p13, %p897_p12 }
  0x17   : > { %p892_p10 = pnand %p890_p9, %p880_p8 }
  0x19   : > { %p893_p11 = pneg %p892_p10 }
  0x1b   : > { %p900_p2 = pnand %p899_p0, %p893_p11 }
  0x1d   : > { %903 = shalt.err (!%p900_p2)
}
  0x1e   : > { %s1047_s7 = smov 128   ;;  %s1048_s8 = smov 8  }
  0x1f   : > { %788 = dma.hbm_to_vmem [thread:$0]  (!%p1136_p7), %s1256_s2, 6144, %s158_s28, [#allocation9], %s1047_s7, %s1047_s7, %s1048_s8  }
  0x20   : > { %s915_s11 = scalar_lea.vmem %s171_s5, 1024  ;;  %p923_p10 = scmp.lt.s32.totalorder %s171_s5, %s171_s5 }
  0x21   : > { %p916_p3 = scmp.ne.s32.totalorder %s171_s5, %s915_s11  ;;  %p924_p1 = scmp.lt.s32.totalorder %s915_s11, %s915_s11 }
  0x23   : > { %p918_p6 = pnand %p916_p3, %p880_p8  ;;  %p925_p12 = por %p924_p1, %p923_p10 }
  0x25   : > { %p919_p9 = pneg %p918_p6 }
  0x27   : > { %p926_p11 = pnand %p925_p12, %p919_p9 }
  0x29   : > { %929 = shalt.err (!%p926_p11)
}
  0x2a   : > { %s1049_s12 = smov 64   ;;  %s1050_s13 = smov 4  }
  0x2b   : > { %791 = dma.hbm_to_vmem [thread:$0]  (!%p1136_p7), %s1257_s3, 1024, %s171_s5, [#allocation9], %s1049_s12, %s1049_s12, %s1050_s13  }
  0x2c   : > { %s38_s16 = sadd.s32 1, %s1038_s22  ;;  %s53_s17 = sadd.s32 1, %s1030_s20 }
  0x2d   : > { %p40_p1 = scmp.ge.s32.totalorder %s38_s16, 3  ;;  %p60_p8 = scmp.ne.s32.totalorder %s1030_s20, %s1026_s19 }
  0x2e   : > { %p61_p13 = scmp.eq.s32.totalorder %s1042_s23, 0  ;;  %p798_p0 = scmp.lt.s32.totalorder %s1042_s23, 3 }
  0x2f   : > { %s1274_s16 = smov (%p40_p1, %s38_s16), 0  ;;  %s184_s18 = sand.u32 1, %s1030_s20  }
  0x30   : > { %p62_p2 = por %p61_p13, %p60_p8  ;;  %s46_s27 = ssub.s32 %s1038_s22, %s1274_s16 }
  0x31   : > { %p51_p3 = scmp.eq.s32.totalorder %s46_s27, 0  ;;  %s629_s28 = sshll.u32 %s184_s18, 3 }
  0x32   : > { %s630_s29 = sshll.u32 %s1038_s22, 7  ;;  %s188_s8 = scalar_lea.vmem [#allocation5], %s629_s28 }
  0x33   : > { %s1171_s30 = scalar_select %p51_p3, %s1030_s20, %s53_s17  }
  0x34   : > { %s195_s7 = scalar_lea.hbm %s1255_s1, %s630_s29  ;;  %s197_s9 = sshll.u32 %s188_s8, 4  ;;  %s198_s9 = int_to_ptr.vmem [resolvable:$true] %s197_s9 }
  0x35   : > { %p1178_p7 = pnand %p798_p0, %p62_p2  ;;  %s185_s11 = scalar_lea.sflag [#allocation6], %s184_s18 }
  0x36   : > { %s943_s12 = scalar_lea.vmem %s198_s9, 128  ;;  %s1051_s13 = smov [#allocation5]  }
  0x37   : > { %p932_p6 = pneg %p1178_p7  ;;  %p944_p9 = scmp.ne.s32.totalorder %s198_s9, %s943_s12 }
  0x38   : > { %s948_s14 = sshll.u32 %s1051_s13, 4  ;;  %s949_s14 = int_to_ptr.vmem [resolvable:$false] %s948_s14 }
  0x39   : > { %p946_p10 = pnand %p944_p9, %p932_p6  ;;  %s950_s15 = scalar_lea.vmem %s949_s14, 256 }
  0x3a   : > { %p951_p11 = scmp.lt.s32.totalorder %s198_s9, %s949_s14  ;;  %p952_p1 = scmp.lt.s32.totalorder %s950_s15, %s943_s12 }
  0x3b   : > { %p947_p12 = pneg %p946_p10 }
  0x3c   : > { %p953_p8 = por %p952_p1, %p951_p11 }
  0x3e   : > { %p954_p13 = pnand %p953_p8, %p947_p12 }
  0x40   : > { %957 = shalt.err (!%p954_p13)
}
  0x41   : > { %795 = dma.hbm_to_vmem [thread:$0]  (!%p1178_p7), %s195_s7, 128, %s198_s9, %s185_s11  }
  0x42   : > { %206 = sbr.rel (%p1128_p5) target bundleno = 584 (0x248), region = 32  ;;  %s208_s17 = sand.u32 (!%p1128_p5), 1, %s1026_s19  }
  0x43   : > { %s632_s18 = sshll.u32 (!%p1128_p5), %s208_s17, 3  ;;  %s209_s27 = scalar_lea.sflag (!%p1128_p5), [#allocation6], %s208_s17 }
  0x44   : > { %s212_s28 = scalar_lea.vmem (!%p1128_p5), [#allocation5], %s632_s18 }
  0x47   : > { %1009 = dma.done.wait (%p1124_p4), %s209_s27, 128  }
  0x48   : > { %1011 = vsyncadd (%p1124_p4), %s209_s27, 4294967168  ;;  %p1266_p0 = scmp.ne.s32.totalorder %s1261_s24, 0 }
  0x4a   : > { %1013 = dma.done.wait (%p1266_p0), [#allocation9], 7168  }
  0x4b   : > { %1015 = vsyncadd (%p1266_p0), [#allocation9], 4294960128  ;;  %s251_s26 = sld [smem:[#allocation4 + %s1034_s21]]  ;;  %v1052_v0 = vmov 0.0  }
  0x4c   : > { %244 = vst [vmem:[#allocation2 + $0x10] sm:$0xff] %v1052_v0  ;;  %245 = vst [vmem:[#allocation2] sm:$0xff] %v1052_v0 }
  0x4d   : > { %246 = vst [vmem:[#allocation2 + $0x18] sm:$0xff] %v1052_v0  ;;  %247 = vst [vmem:[#allocation2 + $0x8] sm:$0xff] %v1052_v0 }
  0x51   : > { %p635_p5 = scmp.le.s32.totalorder %s251_s26, 0 }
  0x53   : > { %255 = sbr.rel (%p635_p5) target bundleno = 323 (0x143), region = 52 }
  0x58   : > { %v862_v1 = vld [vmem:[#allocation10 + $0x38] sm:$0xff]   ;;  %v863_v2 = vld [vmem:[#allocation10 + $0x30] sm:$0xff]   ;;  %v864_v3 = vld [vmem:[#allocation10 + $0x28] sm:$0xff]  }
  0x59   : > { %681 = vmatprep.subr.bf16.mxu0 %v862_v1  ;;  %v865_v4 = vld [vmem:[#allocation10 + $0x20] sm:$0xff]   ;;  %v277_v5 = vld [vmem:[%s212_s28] sm:$0xff]  ;;  %v868_v9 = vld [vmem:[#allocation10 + $0x8] sm:$0xff]  }
  0x5a   : > { %682 = vmatpush3.bf16.msra.mxu0 %v862_v1  ;;  %v278_v6 = vunpack.c.l.s8.bf16 %v277_v5  ;;  %v866_v7 = vld [vmem:[#allocation10 + $0x18] sm:$0xff]   ;;  %v867_v8 = vld [vmem:[#allocation10 + $0x10] sm:$0xff]   ;;  %v869_v10 = vld [vmem:[#allocation10] sm:$0xff]   ;;  %v279_v11 = vunpack.c.h.s8.bf16 %v277_v5 }
  0x5b   : > { %683 = vmatprep.subr.bf16.mxu0 %v863_v2  ;;  %v282_v12 = vld [vmem:[#allocation2 + $0x18] sm:$0xff]  ;;  %v280_v14 = vld [vmem:[#allocation2 + $0x10] sm:$0xff]  ;;  %v283_v17 = vld [vmem:[#allocation2 + $0x8] sm:$0xff] }
  0x5c   : > { %697 = vmatprep.mubr.bf16.mxu0 %v278_v6  ;;  %v281_v20 = vld [vmem:[#allocation2] sm:$0xff] }
  0x5e   : > { %684 = vmatpush3.bf16.msra.mxu0 %v863_v2 }
  0x5f   : > { %685 = vmatprep.subr.bf16.mxu0 %v864_v3 }
  0x62   : > { %686 = vmatpush3.bf16.msra.mxu0 %v864_v3 }
  0x63   : > { %687 = vmatprep.subr.bf16.mxu0 %v865_v4 }
  0x66   : > { %688 = vmatpush3.bf16.msra.mxu0 %v865_v4 }
  0x67   : > { %689 = vmatprep.subr.bf16.mxu0 %v866_v7 }
  0x6a   : > { %690 = vmatpush3.bf16.msra.mxu0 %v866_v7 }
  0x6b   : > { %691 = vmatprep.subr.bf16.mxu0 %v867_v8 }
  0x6e   : > { %692 = vmatpush3.bf16.msra.mxu0 %v867_v8 }
  0x6f   : > { %693 = vmatprep.subr.bf16.mxu0 %v868_v9 }
  0x72   : > { %694 = vmatpush3.bf16.msra.mxu0 %v868_v9 }
  0x73   : > { %695 = vmatprep.subr.bf16.mxu0 %v869_v10 }
  0x76   : > { %696 = vmatpush3.bf16.msra.mxu0 %v869_v10 }
  0x79   : > { %698 = vmatmul.mubr.bf16.vlgmr.msra.gmra.mxu0 %v279_v11 }
 0x139   : > { %v699_v13 = vpop.f32.mrf.mxu0 }
 0x13a   : > { %v383_v15 = vadd.f32 %v699_v13, %v282_v12 }
 0x13b   : > { %v366_v16 = vpop.f32.mrf.mxu0 }
 0x13c   : > { %387 = vst [vmem:[#allocation2 + $0x18] sm:$0xff] %v383_v15  ;;  %v381_v18 = vadd.f32 %v366_v16, %v280_v14 }
 0x13d   : > { %v700_v19 = vpop.f32.mrf.mxu0 }
 0x13e   : > { %385 = vst [vmem:[#allocation2 + $0x10] sm:$0xff] %v381_v18  ;;  %v384_v21 = vadd.f32 %v700_v19, %v283_v17 }
 0x13f   : > { %v369_v22 = vpop.f32.mrf.mxu0 }
 0x140   : > { %388 = vst [vmem:[#allocation2 + $0x8] sm:$0xff] %v384_v21  ;;  %v382_v23 = vadd.f32 %v369_v22, %v281_v20 }
 0x142   : > { %386 = vst [vmem:[#allocation2] sm:$0xff] %v382_v23 }
 0x143 PF: > { %s644_s24 = sshll.u32 %s1034_s21, 7  ;;  %v394_v25 = vld [vmem:[#allocation2 + $0x18] sm:$0xff]  ;;  %p645_p4 = scmp.ne.s32.totalorder %s1034_s21, 0 }
 0x144   : > { %736 = vmatprep.mubr.f32.mxu1 %v394_v25  ;;  %s1199_s25 = scalar_lea.vmem [#allocation8], %s644_s24 }
 0x145   : > { %v392_v24 = vld [vmem:[#allocation2 + $0x10] sm:$0xff]  ;;  %v413_v26 = vld [vmem:[%s1199_s25 + $0x78] sm:$0xff]  ;;  %v411_v28 = vld [vmem:[%s1199_s25 + $0x68] sm:$0xff] }
 0x146   : > { %733 = vmatprep.mubr.f32.mxu0 %v392_v24  ;;  %v412_v27 = vld [vmem:[%s1199_s25 + $0x70] sm:$0xff]  ;;  %701 = vmatprep.subr.mxu0 %v413_v26  ;;  %v410_v29 = vld [vmem:[%s1199_s25 + $0x60] sm:$0xff]  ;;  %v409_v30 = vld [vmem:[%s1199_s25 + $0x58] sm:$0xff] }
 0x147   : > { %739 = vmatprep.subr.mxu1 %v413_v26  ;;  %702 = vmatpush3.msra.mxu0 %v413_v26  ;;  %v408_v31 = vld [vmem:[%s1199_s25 + $0x50] sm:$0xff]  ;;  %v407_v32 = vld [vmem:[%s1199_s25 + $0x48] sm:$0xff]  ;;  %v406_v33 = vld [vmem:[%s1199_s25 + $0x40] sm:$0xff] }
 0x148   : > { %755 = vmatpush3.msra.mxu1 %v413_v26  ;;  %703 = vmatprep.subr.mxu0 %v412_v27  ;;  %v405_v34 = vld [vmem:[%s1199_s25 + $0x38] sm:$0xff]  ;;  %v404_v35 = vld [vmem:[%s1199_s25 + $0x30] sm:$0xff]  ;;  %v403_v36 = vld [vmem:[%s1199_s25 + $0x28] sm:$0xff] }
 0x149   : > { %740 = vmatprep.subr.mxu1 %v412_v27  ;;  %704 = vmatpush3.msra.mxu0 %v412_v27  ;;  %v402_v37 = vld [vmem:[%s1199_s25 + $0x20] sm:$0xff]  ;;  %v401_v38 = vld [vmem:[%s1199_s25 + $0x18] sm:$0xff]  ;;  %v400_v39 = vld [vmem:[%s1199_s25 + $0x10] sm:$0xff] }
 0x14a   : > { %756 = vmatpush3.msra.mxu1 %v412_v27  ;;  %705 = vmatprep.subr.mxu0 %v411_v28  ;;  %v399_v40 = vld [vmem:[%s1199_s25 + $0x8] sm:$0xff]  ;;  %v398_v41 = vld [vmem:[%s1199_s25] sm:$0xff] }
 0x14b   : > { %741 = vmatprep.subr.mxu1 %v411_v28  ;;  %706 = vmatpush3.msra.mxu0 %v411_v28  ;;  %v393_v42 = vld [vmem:[#allocation2] sm:$0xff]  ;;  %v395_v43 = vld [vmem:[#allocation2 + $0x8] sm:$0xff] }
 0x14c   : > { %757 = vmatpush3.msra.mxu1 %v411_v28  ;;  %707 = vmatprep.subr.mxu0 %v410_v29 }
 0x14d   : > { %742 = vmatprep.subr.mxu1 %v410_v29  ;;  %708 = vmatpush3.msra.mxu0 %v410_v29 }
 0x14e   : > { %758 = vmatpush3.msra.mxu1 %v410_v29  ;;  %709 = vmatprep.subr.mxu0 %v409_v30 }
 0x14f   : > { %743 = vmatprep.subr.mxu1 %v409_v30  ;;  %710 = vmatpush3.msra.mxu0 %v409_v30 }
 0x150   : > { %759 = vmatpush3.msra.mxu1 %v409_v30  ;;  %711 = vmatprep.subr.mxu0 %v408_v31 }
 0x151   : > { %744 = vmatprep.subr.mxu1 %v408_v31  ;;  %712 = vmatpush3.msra.mxu0 %v408_v31 }
 0x152   : > { %760 = vmatpush3.msra.mxu1 %v408_v31  ;;  %713 = vmatprep.subr.mxu0 %v407_v32 }
 0x153   : > { %745 = vmatprep.subr.mxu1 %v407_v32  ;;  %714 = vmatpush3.msra.mxu0 %v407_v32 }
 0x154   : > { %761 = vmatpush3.msra.mxu1 %v407_v32  ;;  %715 = vmatprep.subr.mxu0 %v406_v33 }
 0x155   : > { %746 = vmatprep.subr.mxu1 %v406_v33  ;;  %716 = vmatpush3.msra.mxu0 %v406_v33 }
 0x156   : > { %762 = vmatpush3.msra.mxu1 %v406_v33  ;;  %717 = vmatprep.subr.mxu0 %v405_v34 }
 0x157   : > { %747 = vmatprep.subr.mxu1 %v405_v34  ;;  %718 = vmatpush3.msra.mxu0 %v405_v34 }
 0x158   : > { %763 = vmatpush3.msra.mxu1 %v405_v34  ;;  %719 = vmatprep.subr.mxu0 %v404_v35 }
 0x159   : > { %748 = vmatprep.subr.mxu1 %v404_v35  ;;  %720 = vmatpush3.msra.mxu0 %v404_v35 }
 0x15a   : > { %764 = vmatpush3.msra.mxu1 %v404_v35  ;;  %721 = vmatprep.subr.mxu0 %v403_v36 }
 0x15b   : > { %749 = vmatprep.subr.mxu1 %v403_v36  ;;  %722 = vmatpush3.msra.mxu0 %v403_v36 }
 0x15c   : > { %765 = vmatpush3.msra.mxu1 %v403_v36  ;;  %723 = vmatprep.subr.mxu0 %v402_v37 }
 0x15d   : > { %750 = vmatprep.subr.mxu1 %v402_v37  ;;  %724 = vmatpush3.msra.mxu0 %v402_v37 }
 0x15e   : > { %766 = vmatpush3.msra.mxu1 %v402_v37  ;;  %725 = vmatprep.subr.mxu0 %v401_v38 }
 0x15f   : > { %751 = vmatprep.subr.mxu1 %v401_v38  ;;  %726 = vmatpush3.msra.mxu0 %v401_v38 }
 0x160   : > { %767 = vmatpush3.msra.mxu1 %v401_v38  ;;  %727 = vmatprep.subr.mxu0 %v400_v39 }
 0x161   : > { %752 = vmatprep.subr.mxu1 %v400_v39  ;;  %728 = vmatpush3.msra.mxu0 %v400_v39 }
 0x162   : > { %768 = vmatpush3.msra.mxu1 %v400_v39  ;;  %729 = vmatprep.subr.mxu0 %v399_v40 }
 0x163   : > { %753 = vmatprep.subr.mxu1 %v399_v40  ;;  %730 = vmatpush3.msra.mxu0 %v399_v40 }
 0x164   : > { %769 = vmatpush3.msra.mxu1 %v399_v40  ;;  %731 = vmatprep.subr.mxu0 %v398_v41 }
 0x165   : > { %754 = vmatprep.subr.mxu1 %v398_v41  ;;  %732 = vmatpush3.msra.mxu0 %v398_v41 }
 0x166   : > { %770 = vmatpush3.msra.mxu1 %v398_v41  ;;  %734 = vmatmul.mubr.f32.vlgmr.msra.gmra.mxu0 %v393_v42 }
 0x167   : > { %737 = vmatmul.mubr.f32.vlgmr.msra.gmra.mxu1 %v395_v43 }
 0x225   : > { %502 = sbr.rel (%p645_p4) target bundleno = 556 (0x22c), region = 60 }
 0x226   : > { %v735_v44 = vpop.f32.mrf.mxu0 }
 0x227   : > { %v738_v45 = vpop.f32.mrf.mxu1 }
 0x228   : > { %v480_v46 = vpop.f32.mrf.mxu0 }
 0x229   : > { %v490_v47 = vpop.f32.mrf.mxu1 }
 0x22a   : > { %503 = vst [vmem:[#allocation11] sm:$0xff] %v480_v46  ;;  %504 = vst [vmem:[#allocation11 + $0x8] sm:$0xff] %v735_v44 }
 0x22b   : > { %505 = vst [vmem:[#allocation11 + $0x10] sm:$0xff] %v490_v47  ;;  %506 = vst [vmem:[#allocation11 + $0x18] sm:$0xff] %v738_v45 }
 0x22c PF: > { %p646_p2 = scmp.le.s32.totalorder %s1034_s21, 0 }
 0x22e   : > { %510 = sbr.rel (%p646_p2) target bundleno = 568 (0x238), region = 64 }
 0x233   : > { %v511_v48 = vld [vmem:[#allocation11] sm:$0xff]  ;;  %v512_v49 = vld [vmem:[#allocation11 + $0x8] sm:$0xff]  ;;  %v513_v50 = vld [vmem:[#allocation11 + $0x10] sm:$0xff] }
 0x234   : > { %v515_v51 = vadd.f32 %v511_v48, %v480_v46  ;;  %v516_v52 = vadd.f32 %v735_v44, %v512_v49  ;;  %v517_v53 = vadd.f32 %v513_v50, %v490_v47  ;;  %v514_v54 = vld [vmem:[#allocation11 + $0x18] sm:$0xff] }
 0x235   : > { %v518_v55 = vadd.f32 %v738_v45, %v514_v54 }
 0x236   : > { %519 = vst [vmem:[#allocation11] sm:$0xff] %v515_v51  ;;  %520 = vst [vmem:[#allocation11 + $0x8] sm:$0xff] %v516_v52 }
 0x237   : > { %521 = vst [vmem:[#allocation11 + $0x10] sm:$0xff] %v517_v53  ;;  %522 = vst [vmem:[#allocation11 + $0x18] sm:$0xff] %v518_v55 }
 0x238 PF: > { %p1221_p3 = scmp.eq.s32.totalorder %s624_s0, 2  ;;  %s1053_s21 = smov [#allocation11]  }
 0x239   : > { %s532_s6 = sshll.u32 %s1053_s21, 4  ;;  %s533_s6 = int_to_ptr.vmem [resolvable:$true] %s532_s6 }
 0x23a   : > { %s958_s5 = scalar_lea.vmem %s533_s6, 512  ;;  %p965_p10 = scmp.lt.s32.totalorder %s533_s6, %s533_s6 }
 0x23b   : > { %p959_p7 = scmp.ne.s32.totalorder %s533_s6, %s958_s5  ;;  %p966_p12 = scmp.lt.s32.totalorder %s958_s5, %s958_s5 }
 0x23d   : > { %p960_p6 = pnand %p959_p7, %p1221_p3  ;;  %p967_p11 = por %p966_p12, %p965_p10 }
 0x23f   : > { %p961_p9 = pneg %p960_p6 }
 0x241   : > { %p968_p1 = pnand %p967_p11, %p961_p9 }
 0x243   : > { %971 = shalt.err (!%p968_p1)
}
 0x244   : > { %s1054_s7 = smov 128   ;;  %s1055_s0 = smov 8  }
 0x245   : > { %782 = dma.vmem_to_hbm [thread:$0]  (%p1221_p3), %s533_s6, 512, %s1258_s4, [#allocation7], %s1054_s7, %s1054_s7, %s1055_s0  }
 0x246   : > { %1017 = dma.done.wait (%p1221_p3), [#allocation7], 512  }
 0x247   : > { %1019 = vsyncadd (%p1221_p3), [#allocation7], 4294966784 }
 0x248 PF: > { %s23_s23 = sadd.s32 1, %s1042_s23   ;;  %s1268_s18 = smov %s1026_s19 }
 0x249   : > { %p20_p8 = scmp.ge.s32.totalorder %s23_s23, 5   ;;  %s1269_s19 = smov %s1030_s20 }
 0x24a   : > { %s1270_s20 = smov %s1171_s30  ;;  %s1271_s21 = smov %s1038_s22 }
 0x24b   : > { %s1272_s22 = smov %s1274_s16  ;;  %22 = sbr.rel (!%p20_p8) target bundleno = 11 (0xb), region = 100 }
 0x250   :  { %548 = vsyncpa [#allocation6], 1 }
 0x251   :  { %550 = vsyncpa [#allocation6 + $0x1], 1 }
 0x252   :  { %551 = vsyncpa [#allocation9], 1 }
 0x253   :  { %552 = vsyncpa [#allocation7], 1 }
 0x254   :  { %554 = vsyncpa [#allocation7 + $0x1], 1 }

</bundles_post_ra>
